<compile_context>
chip_gen: v5e
topology: v5e:2x2
jax: 0.10.0
libtpu: 0.0.40
codegen_flags: <defaults>
</compile_context>

<pallas_src>
import jax
import jax.numpy as jnp
from jax import lax
from jax.experimental import pallas as pl
from jax.experimental.pallas import tpu as pltpu

WIN_SIZE = 81.0       # module hard-codes 81 (even though the filter has 27 taps)
EPS = 1e-5
IN_CHANNELS = 3       # module's all-ones filter has 3 input channels
NUM_OUT_CHANNELS = 16  # module default batch_size; all output channels identical


# --------------------------------------------------------------------------
# Hardware-aware configuration
# --------------------------------------------------------------------------
def _vmem_capacity_bytes():
    """Per-core VMEM capacity; conservative fallback if the query fails."""
    try:
        return int(pltpu.get_tpu_info().vmem_capacity_bytes)
    except Exception:
        return 64 * 1024 * 1024  # v7x per-TensorCore VMEM (smallest generation)


def _choose_tiles(N, C, H, W, itemsize, budget, soft):
    """Pick (batch_tile, row_tile).  Prefer a moderate per-step working set so
    the grid has enough steps to pipeline DMA and shard across TensorCores,
    but never exceed the hard VMEM budget."""
    tb_cands = [t for t in (64, 32, 16, 8, 4, 2, 1) if N % t == 0]
    th_cands = [H] + [t for t in (1024, 512, 256, 128, 64, 32, 16, 8)
                      if t < H and H % t == 0]

    def footprint(tb, th):
        main = 2 * 2 * tb * C * th * W * itemsize   # I, J main blocks, dbl-buffered
        halo = 4 * 2 * tb * C * 8 * W * itemsize    # 4 halo blocks, dbl-buffered
        work = 16 * tb * th * W * 4                 # live f32 planes (with margin)
        return main + halo + work

    for cap in (min(soft, budget), budget):
        for th in th_cands:                         # prefer taller row tiles
            for tb in tb_cands:                     # then wider batch tiles
                if footprint(tb, th) <= cap:
                    return tb, th
    return tb_cands[-1], th_cands[-1]


# --------------------------------------------------------------------------
# In-kernel math
# --------------------------------------------------------------------------
def _box3(S, top_edge, bot_edge, masks):
    """3x3 all-ones box filter of S (== F.conv2d with a single all-ones output
    channel, padding=1), with explicit top/bottom halo rows.

    S: (TB, TH, W) f32.  top_edge/bot_edge: (TB, 1, W) rows just above/below
    this tile (already zeroed where the tile touches the image boundary).
    Left/right borders are always zero-padded (true image borders)."""
    TB, TH, W = S.shape
    if masks is not None:
        # roll + boundary masks: stays (TB,TH,W)-shaped, uses the XLU slot and
        # avoids the relayout copies of pad/concatenate.
        is_top, is_bot, is_left, is_right = masks
        up = jnp.where(is_top, top_edge, pltpu.roll(S, shift=1, axis=1))
        dn = jnp.where(is_bot, bot_edge, pltpu.roll(S, shift=TH - 1, axis=1))
        v = up + S + dn
        lt = jnp.where(is_left, 0.0, pltpu.roll(v, shift=1, axis=2))
        rt = jnp.where(is_right, 0.0, pltpu.roll(v, shift=W - 1, axis=2))
        return lt + v + rt
    # Fallback for lane-unaligned tiles: same-shape shifted concats
    # (no (H+2, W+2) intermediates).
    up = jnp.concatenate([top_edge, S[:, :TH - 1, :]], axis=1)
    dn = jnp.concatenate([S[:, 1:, :], bot_edge], axis=1)
    v = up + S + dn
    zc = jnp.zeros((TB, TH, 1), jnp.float32)
    lt = jnp.concatenate([zc, v[:, :, :W - 1]], axis=2)
    rt = jnp.concatenate([v[:, :, 1:], zc], axis=2)
    return lt + v + rt


def _halo_maps(i_row, j_row, keep):
    """Channel-reduced maps (Ic, Jc, I2c, J2c, IJc) of one halo row.
    i_row/j_row: (TB, C, 1, W) raw-dtype values; keep: scalar 0/1 factor that
    zeroes the row when the tile touches the image boundary (zero padding)."""
    it = i_row.astype(jnp.float32) * keep
    jt = j_row.astype(jnp.float32) * keep
    return (jnp.sum(it, axis=1), jnp.sum(jt, axis=1),
            jnp.sum(it * it, axis=1), jnp.sum(jt * jt, axis=1),
            jnp.sum(it * jt, axis=1))


def _ncc_tile_body(i_ref, j_ref, o_ref, halo_refs, use_roll):
    TB, C, TH, W = i_ref.shape

    # ---- channel reduction, streamed one input channel at a time ----
    Ic = Jc = I2c = J2c = IJc = None
    for c in range(C):
        ic = i_ref[:, c, :, :].astype(jnp.float32)     # (TB, TH, W)
        jc = j_ref[:, c, :, :].astype(jnp.float32)
        if c == 0:
            Ic, Jc, I2c, J2c, IJc = ic, jc, ic * ic, jc * jc, ic * jc
        else:
            Ic = Ic + ic
            Jc = Jc + jc
            I2c = I2c + ic * ic
            J2c = J2c + jc * jc
            IJc = IJc + ic * jc

    # ---- halo rows for the vertical tap (row-tiling support) ----
    if halo_refs is None:
        zedge = jnp.zeros((TB, 1, W), jnp.float32)
        tops = (zedge,) * 5
        bots = (zedge,) * 5
    else:
        it_ref, jt_ref, ib_ref, jb_ref = halo_refs
        t = pl.program_id(1)
        top_keep = (t > 0).astype(jnp.float32)                     # 0 at image top
        bot_keep = (t < pl.num_programs(1) - 1).astype(jnp.float32)  # 0 at bottom
        # halo blocks are 8 rows; the needed row sits at local index 7 (above)
        # and 0 (below) of the clamped blocks.
        tops = _halo_maps(it_ref[:, :, 7:8, :], jt_ref[:, :, 7:8, :], top_keep)
        bots = _halo_maps(ib_ref[:, :, 0:1, :], jb_ref[:, :, 0:1, :], bot_keep)

    # boundary masks hoisted once (JAX does not CSE broadcast_in_dim)
    if use_roll:
        rows = lax.broadcasted_iota(jnp.int32, (TB, TH, W), 1)
        cols = lax.broadcasted_iota(jnp.int32, (TB, TH, W), 2)
        masks = (rows == 0, rows == TH - 1, cols == 0, cols == W - 1)
    else:
        masks = None

    # ---- separable 3x3 box sums, one map at a time ----
    I_sum = _box3(Ic, tops[0], bots[0], masks)
    J_sum = _box3(Jc, tops[1], bots[1], masks)
    I2_sum = _box3(I2c, tops[2], bots[2], masks)
    J2_sum = _box3(J2c, tops[3], bots[3], masks)
    IJ_sum = _box3(IJc, tops[4], bots[4], masks)

    # ---- NCC formula, faithful to the module (win_size=81 quirk included) ----
    u_I = I_sum / WIN_SIZE
    u_J = J_sum / WIN_SIZE
    cross = IJ_sum - u_J * I_sum - u_I * J_sum + u_I * u_J * WIN_SIZE
    I_var = I2_sum - 2.0 * u_I * I_sum + u_I * u_I * WIN_SIZE
    J_var = J2_sum - 2.0 * u_J * J_sum + u_J * u_J * WIN_SIZE
    cc = (cross * cross) / (I_var * J_var + EPS)

    # Per-lane partial sum (reduce batch + sublane axes only); the cross-lane /
    # cross-tile reduction and -log10 happen in the JAX wrapper.
    o_ref[...] = jnp.sum(cc, axis=(0, 1), keepdims=True).reshape(1, 1, 1, W)


def _make_kernel(use_halo, use_roll):
    if use_halo:
        def kernel(i_ref, j_ref, it_ref, jt_ref, ib_ref, jb_ref, o_ref):
            _ncc_tile_body(i_ref, j_ref, o_ref,
                           (it_ref, jt_ref, ib_ref, jb_ref), use_roll)
    else:
        def kernel(i_ref, j_ref, o_ref):
            _ncc_tile_body(i_ref, j_ref, o_ref, None, use_roll)
    return kernel


# --------------------------------------------------------------------------
# Wrapper
# --------------------------------------------------------------------------
def ncc_pallas(I, J, *, batch_tile=None, row_tile=None):
    assert I.shape == J.shape and I.ndim == 4
    N, C, H, W = I.shape
    assert C == IN_CHANNELS, "module's all-ones filter expects 3 input channels"

    vmem_cap = _vmem_capacity_bytes()
    vmem_limit = int(0.70 * vmem_cap)            # ~44 MiB v7x, ~90 MiB v5e/v6e
    itemsize = jnp.dtype(I.dtype).itemsize
    TB, TH = _choose_tiles(N, C, H, W, itemsize,
                           budget=int(0.8 * vmem_limit),
                           soft=24 * 1024 * 1024)
    if batch_tile is not None:
        TB = batch_tile
    if row_tile is not None:
        TH = row_tile
    assert N % TB == 0
    assert H % TH == 0 and (TH == H or TH % 8 == 0)

    nb, nt = N // TB, H // TH
    use_halo = nt > 1
    # roll-based taps only on lane/sublane-aligned tiles; lane-sparse small-W
    # shapes take the concat fallback (their tap cost is small anyway).
    use_roll = (W % 128 == 0) and (TH % 8 == 0)

    block_spec = pl.BlockSpec((TB, C, TH, W), lambda b, t: (b, 0, t, 0))
    in_specs = [block_spec, block_spec]
    operands = [I, J]
    if use_halo:
        th8 = TH // 8
        last8 = H // 8 - 1
        # 8-row, (8,128)-compliant halo blocks; index clamped at the image
        # boundary (contents are masked to zero there inside the kernel).
        top_spec = pl.BlockSpec(
            (TB, C, 8, W), lambda b, t: (b, 0, jnp.maximum(t * th8 - 1, 0), 0))
        bot_spec = pl.BlockSpec(
            (TB, C, 8, W), lambda b, t: (b, 0, jnp.minimum((t + 1) * th8, last8), 0))
        in_specs += [top_spec, top_spec, bot_spec, bot_spec]
        operands += [I, J, I, J]

    partials = pl.pallas_call(
        _make_kernel(use_halo, use_roll),
        out_shape=jax.ShapeDtypeStruct((nb, nt, 1, W), jnp.float32),
        grid_spec=pltpu.PrefetchScalarGridSpec(
            num_scalar_prefetch=0,
            grid=(nb, nt),
            in_specs=in_specs,
            out_specs=pl.BlockSpec((1, 1, 1, W), lambda b, t: (b, t, 0, 0)),
        ),
        compiler_params=pltpu.CompilerParams(
            dimension_semantics=("parallel", "parallel"),  # no cross-step carry
            vmem_limit_bytes=vmem_limit,
        ),
    )(*operands)

    # All NUM_OUT_CHANNELS conv output channels are identical, so the mean over
    # (N, out_channels, H, W) equals the mean over (N, H, W) of one channel.
    mean_cc = jnp.sum(partials) / jnp.float32(N * H * W)
    return -jnp.log10(mean_cc)


# --------------------------------------------------------------------------
# Pure-JAX reference with the module's exact math (correctness check)
# --------------------------------------------------------------------------
def ncc_reference(I, J):
    N, C, H, W = I.shape
    I = I.astype(jnp.float32)
    J = J.astype(jnp.float32)

    def conv_ones(x):
        xp = jnp.pad(x, ((0, 0), (0, 0), (1, 1), (1, 1)))
        s = jnp.sum(xp, axis=1)  # (N, H+2, W+2)
        acc = jnp.zeros((N, H, W), jnp.float32)
        for dy in range(3):
            for dx in range(3):
                acc = acc + s[:, dy:dy + H, dx:dx + W]
        return acc

    I_sum = conv_ones(I)
    J_sum = conv_ones(J)
    I2_sum = conv_ones(I * I)
    J2_sum = conv_ones(J * J)
    IJ_sum = conv_ones(I * J)

    u_I = I_sum / WIN_SIZE
    u_J = J_sum / WIN_SIZE
    cross = IJ_sum - u_J * I_sum - u_I * J_sum + u_I * u_J * WIN_SIZE
    I_var = I2_sum - 2.0 * u_I * I_sum + u_I * u_I * WIN_SIZE
    J_var = J2_sum - 2.0 * u_J * J_sum + u_J * u_J * WIN_SIZE
    cc = cross * cross / (I_var * J_var + EPS)
    return -jnp.log10(jnp.mean(cc))


if __name__ == "__main__":
    key = jax.random.PRNGKey(0)
    k1, k2 = jax.random.split(key)
    N, C, H, W = 2, 3, 16, 16
    I = jax.random.normal(k1, (N, C, H, W), dtype=jnp.float32)
    J = jax.random.normal(k2, (N, C, H, W), dtype=jnp.float32)

    ref = ncc_reference(I, J)

    # 1) default tiling (whole image per grid step at this small size).
    out = jax.jit(ncc_pallas)(I, J)
    jax.block_until_ready(out)
    assert jnp.allclose(out, ref, rtol=1e-4, atol=1e-5), (out, ref)

    # 2) forced row tiling: exercises the halo / spatial-tiling path.
    out_rt = jax.jit(lambda a, b: ncc_pallas(a, b, row_tile=8))(I, J)
    jax.block_until_ready(out_rt)
    assert jnp.allclose(out_rt, ref, rtol=1e-4, atol=1e-5), (out_rt, ref)

    print("KERNEL_OK")
</pallas_src>

<mosaic_0001>
module attributes {stable_mosaic.version = 11 : i64} {
  func.func @kernel(%arg0: i32, %arg1: i32, %arg2: memref<2x3x16x16xf32, #tpu.memory_space<vmem>>, %arg3: memref<2x3x16x16xf32, #tpu.memory_space<vmem>>, %arg4: memref<1x1x1x16xf32, #tpu.memory_space<vmem>>) attributes {dimension_semantics = [#tpu.dimension_semantics<parallel>, #tpu.dimension_semantics<parallel>], iteration_bounds = array<i64: 1, 1>, scalar_prefetch = 0 : i64, scratch_operands = 0 : i64, tpu.core_type = #tpu.core_type<tc>, window_params = [{transform_indices = @transform_0, window_bounds = array<i64: 2, 3, 16, 16>}, {transform_indices = @transform_1, window_bounds = array<i64: 2, 3, 16, 16>}, {transform_indices = @transform_2, window_bounds = array<i64: 1, 1, 1, 16>}]} {
    %c0 = arith.constant 0 : index
    %c0_0 = arith.constant 0 : index
    %c0_1 = arith.constant 0 : index
    %c0_2 = arith.constant 0 : index
    %0 = vector.load %arg2[%c0, %c0_0, %c0_1, %c0_2] : memref<2x3x16x16xf32, #tpu.memory_space<vmem>>, vector<2x1x16x16xf32>
    %1 = vector.shape_cast %0 : vector<2x1x16x16xf32> to vector<2x16x16xf32>
    %c0_3 = arith.constant 0 : index
    %c0_4 = arith.constant 0 : index
    %c0_5 = arith.constant 0 : index
    %c0_6 = arith.constant 0 : index
    %2 = vector.load %arg3[%c0_3, %c0_4, %c0_5, %c0_6] : memref<2x3x16x16xf32, #tpu.memory_space<vmem>>, vector<2x1x16x16xf32>
    %3 = vector.shape_cast %2 : vector<2x1x16x16xf32> to vector<2x16x16xf32>
    %4 = arith.mulf %1, %1 : vector<2x16x16xf32>
    %5 = arith.mulf %3, %3 : vector<2x16x16xf32>
    %6 = arith.mulf %1, %3 : vector<2x16x16xf32>
    %c0_7 = arith.constant 0 : index
    %c1 = arith.constant 1 : index
    %c0_8 = arith.constant 0 : index
    %c0_9 = arith.constant 0 : index
    %7 = vector.load %arg2[%c0_7, %c1, %c0_8, %c0_9] : memref<2x3x16x16xf32, #tpu.memory_space<vmem>>, vector<2x1x16x16xf32>
    %8 = vector.shape_cast %7 : vector<2x1x16x16xf32> to vector<2x16x16xf32>
    %c0_10 = arith.constant 0 : index
    %c1_11 = arith.constant 1 : index
    %c0_12 = arith.constant 0 : index
    %c0_13 = arith.constant 0 : index
    %9 = vector.load %arg3[%c0_10, %c1_11, %c0_12, %c0_13] : memref<2x3x16x16xf32, #tpu.memory_space<vmem>>, vector<2x1x16x16xf32>
    %10 = vector.shape_cast %9 : vector<2x1x16x16xf32> to vector<2x16x16xf32>
    %11 = arith.addf %1, %8 : vector<2x16x16xf32>
    %12 = arith.addf %3, %10 : vector<2x16x16xf32>
    %13 = arith.mulf %8, %8 : vector<2x16x16xf32>
    %14 = arith.addf %4, %13 : vector<2x16x16xf32>
    %15 = arith.mulf %10, %10 : vector<2x16x16xf32>
    %16 = arith.addf %5, %15 : vector<2x16x16xf32>
    %17 = arith.mulf %8, %10 : vector<2x16x16xf32>
    %18 = arith.addf %6, %17 : vector<2x16x16xf32>
    %c0_14 = arith.constant 0 : index
    %c2 = arith.constant 2 : index
    %c0_15 = arith.constant 0 : index
    %c0_16 = arith.constant 0 : index
    %19 = vector.load %arg2[%c0_14, %c2, %c0_15, %c0_16] : memref<2x3x16x16xf32, #tpu.memory_space<vmem>>, vector<2x1x16x16xf32>
    %20 = vector.shape_cast %19 : vector<2x1x16x16xf32> to vector<2x16x16xf32>
    %c0_17 = arith.constant 0 : index
    %c2_18 = arith.constant 2 : index
    %c0_19 = arith.constant 0 : index
    %c0_20 = arith.constant 0 : index
    %21 = vector.load %arg3[%c0_17, %c2_18, %c0_19, %c0_20] : memref<2x3x16x16xf32, #tpu.memory_space<vmem>>, vector<2x1x16x16xf32>
    %22 = vector.shape_cast %21 : vector<2x1x16x16xf32> to vector<2x16x16xf32>
    %23 = arith.addf %11, %20 : vector<2x16x16xf32>
    %24 = arith.addf %12, %22 : vector<2x16x16xf32>
    %25 = arith.mulf %20, %20 : vector<2x16x16xf32>
    %26 = arith.addf %14, %25 : vector<2x16x16xf32>
    %27 = arith.mulf %22, %22 : vector<2x16x16xf32>
    %28 = arith.addf %16, %27 : vector<2x16x16xf32>
    %29 = arith.mulf %20, %22 : vector<2x16x16xf32>
    %30 = arith.addf %18, %29 : vector<2x16x16xf32>
    %cst = arith.constant 0.000000e+00 : f32
    %31 = vector.broadcast %cst : f32 to vector<2x1x16xf32>
    %32 = vector.extract_strided_slice %23 {offsets = [0, 0, 0], sizes = [2, 15, 16], strides = [1, 1, 1]} : vector<2x16x16xf32> to vector<2x15x16xf32>
    %33 = tpu.concatenate %31, %32 in 1 : vector<2x1x16xf32>, vector<2x15x16xf32> -> vector<2x16x16xf32>
    %34 = vector.extract_strided_slice %23 {offsets = [0, 1, 0], sizes = [2, 15, 16], strides = [1, 1, 1]} : vector<2x16x16xf32> to vector<2x15x16xf32>
    %35 = tpu.concatenate %34, %31 in 1 : vector<2x15x16xf32>, vector<2x1x16xf32> -> vector<2x16x16xf32>
    %36 = arith.addf %33, %23 : vector<2x16x16xf32>
    %37 = arith.addf %36, %35 : vector<2x16x16xf32>
    %cst_21 = arith.constant 0.000000e+00 : f32
    %38 = vector.broadcast %cst_21 : f32 to vector<2x16x1xf32>
    %39 = vector.extract_strided_slice %37 {offsets = [0, 0, 0], sizes = [2, 16, 15], strides = [1, 1, 1]} : vector<2x16x16xf32> to vector<2x16x15xf32>
    %40 = tpu.concatenate %38, %39 in 2 : vector<2x16x1xf32>, vector<2x16x15xf32> -> vector<2x16x16xf32>
    %41 = vector.extract_strided_slice %37 {offsets = [0, 0, 1], sizes = [2, 16, 15], strides = [1, 1, 1]} : vector<2x16x16xf32> to vector<2x16x15xf32>
    %42 = tpu.concatenate %41, %38 in 2 : vector<2x16x15xf32>, vector<2x16x1xf32> -> vector<2x16x16xf32>
    %43 = arith.addf %40, %37 : vector<2x16x16xf32>
    %44 = arith.addf %43, %42 : vector<2x16x16xf32>
    %45 = vector.extract_strided_slice %24 {offsets = [0, 0, 0], sizes = [2, 15, 16], strides = [1, 1, 1]} : vector<2x16x16xf32> to vector<2x15x16xf32>
    %46 = tpu.concatenate %31, %45 in 1 : vector<2x1x16xf32>, vector<2x15x16xf32> -> vector<2x16x16xf32>
    %47 = vector.extract_strided_slice %24 {offsets = [0, 1, 0], sizes = [2, 15, 16], strides = [1, 1, 1]} : vector<2x16x16xf32> to vector<2x15x16xf32>
    %48 = tpu.concatenate %47, %31 in 1 : vector<2x15x16xf32>, vector<2x1x16xf32> -> vector<2x16x16xf32>
    %49 = arith.addf %46, %24 : vector<2x16x16xf32>
    %50 = arith.addf %49, %48 : vector<2x16x16xf32>
    %cst_22 = arith.constant 0.000000e+00 : f32
    %51 = vector.broadcast %cst_22 : f32 to vector<2x16x1xf32>
    %52 = vector.extract_strided_slice %50 {offsets = [0, 0, 0], sizes = [2, 16, 15], strides = [1, 1, 1]} : vector<2x16x16xf32> to vector<2x16x15xf32>
    %53 = tpu.concatenate %51, %52 in 2 : vector<2x16x1xf32>, vector<2x16x15xf32> -> vector<2x16x16xf32>
    %54 = vector.extract_strided_slice %50 {offsets = [0, 0, 1], sizes = [2, 16, 15], strides = [1, 1, 1]} : vector<2x16x16xf32> to vector<2x16x15xf32>
    %55 = tpu.concatenate %54, %51 in 2 : vector<2x16x15xf32>, vector<2x16x1xf32> -> vector<2x16x16xf32>
    %56 = arith.addf %53, %50 : vector<2x16x16xf32>
    %57 = arith.addf %56, %55 : vector<2x16x16xf32>
    %58 = vector.extract_strided_slice %26 {offsets = [0, 0, 0], sizes = [2, 15, 16], strides = [1, 1, 1]} : vector<2x16x16xf32> to vector<2x15x16xf32>
    %59 = tpu.concatenate %31, %58 in 1 : vector<2x1x16xf32>, vector<2x15x16xf32> -> vector<2x16x16xf32>
    %60 = vector.extract_strided_slice %26 {offsets = [0, 1, 0], sizes = [2, 15, 16], strides = [1, 1, 1]} : vector<2x16x16xf32> to vector<2x15x16xf32>
    %61 = tpu.concatenate %60, %31 in 1 : vector<2x15x16xf32>, vector<2x1x16xf32> -> vector<2x16x16xf32>
    %62 = arith.addf %59, %26 : vector<2x16x16xf32>
    %63 = arith.addf %62, %61 : vector<2x16x16xf32>
    %cst_23 = arith.constant 0.000000e+00 : f32
    %64 = vector.broadcast %cst_23 : f32 to vector<2x16x1xf32>
    %65 = vector.extract_strided_slice %63 {offsets = [0, 0, 0], sizes = [2, 16, 15], strides = [1, 1, 1]} : vector<2x16x16xf32> to vector<2x16x15xf32>
    %66 = tpu.concatenate %64, %65 in 2 : vector<2x16x1xf32>, vector<2x16x15xf32> -> vector<2x16x16xf32>
    %67 = vector.extract_strided_slice %63 {offsets = [0, 0, 1], sizes = [2, 16, 15], strides = [1, 1, 1]} : vector<2x16x16xf32> to vector<2x16x15xf32>
    %68 = tpu.concatenate %67, %64 in 2 : vector<2x16x15xf32>, vector<2x16x1xf32> -> vector<2x16x16xf32>
    %69 = arith.addf %66, %63 : vector<2x16x16xf32>
    %70 = arith.addf %69, %68 : vector<2x16x16xf32>
    %71 = vector.extract_strided_slice %28 {offsets = [0, 0, 0], sizes = [2, 15, 16], strides = [1, 1, 1]} : vector<2x16x16xf32> to vector<2x15x16xf32>
    %72 = tpu.concatenate %31, %71 in 1 : vector<2x1x16xf32>, vector<2x15x16xf32> -> vector<2x16x16xf32>
    %73 = vector.extract_strided_slice %28 {offsets = [0, 1, 0], sizes = [2, 15, 16], strides = [1, 1, 1]} : vector<2x16x16xf32> to vector<2x15x16xf32>
    %74 = tpu.concatenate %73, %31 in 1 : vector<2x15x16xf32>, vector<2x1x16xf32> -> vector<2x16x16xf32>
    %75 = arith.addf %72, %28 : vector<2x16x16xf32>
    %76 = arith.addf %75, %74 : vector<2x16x16xf32>
    %cst_24 = arith.constant 0.000000e+00 : f32
    %77 = vector.broadcast %cst_24 : f32 to vector<2x16x1xf32>
    %78 = vector.extract_strided_slice %76 {offsets = [0, 0, 0], sizes = [2, 16, 15], strides = [1, 1, 1]} : vector<2x16x16xf32> to vector<2x16x15xf32>
    %79 = tpu.concatenate %77, %78 in 2 : vector<2x16x1xf32>, vector<2x16x15xf32> -> vector<2x16x16xf32>
    %80 = vector.extract_strided_slice %76 {offsets = [0, 0, 1], sizes = [2, 16, 15], strides = [1, 1, 1]} : vector<2x16x16xf32> to vector<2x16x15xf32>
    %81 = tpu.concatenate %80, %77 in 2 : vector<2x16x15xf32>, vector<2x16x1xf32> -> vector<2x16x16xf32>
    %82 = arith.addf %79, %76 : vector<2x16x16xf32>
    %83 = arith.addf %82, %81 : vector<2x16x16xf32>
    %84 = vector.extract_strided_slice %30 {offsets = [0, 0, 0], sizes = [2, 15, 16], strides = [1, 1, 1]} : vector<2x16x16xf32> to vector<2x15x16xf32>
    %85 = tpu.concatenate %31, %84 in 1 : vector<2x1x16xf32>, vector<2x15x16xf32> -> vector<2x16x16xf32>
    %86 = vector.extract_strided_slice %30 {offsets = [0, 1, 0], sizes = [2, 15, 16], strides = [1, 1, 1]} : vector<2x16x16xf32> to vector<2x15x16xf32>
    %87 = tpu.concatenate %86, %31 in 1 : vector<2x15x16xf32>, vector<2x1x16xf32> -> vector<2x16x16xf32>
    %88 = arith.addf %85, %30 : vector<2x16x16xf32>
    %89 = arith.addf %88, %87 : vector<2x16x16xf32>
    %cst_25 = arith.constant 0.000000e+00 : f32
    %90 = vector.broadcast %cst_25 : f32 to vector<2x16x1xf32>
    %91 = vector.extract_strided_slice %89 {offsets = [0, 0, 0], sizes = [2, 16, 15], strides = [1, 1, 1]} : vector<2x16x16xf32> to vector<2x16x15xf32>
    %92 = tpu.concatenate %90, %91 in 2 : vector<2x16x1xf32>, vector<2x16x15xf32> -> vector<2x16x16xf32>
    %93 = vector.extract_strided_slice %89 {offsets = [0, 0, 1], sizes = [2, 16, 15], strides = [1, 1, 1]} : vector<2x16x16xf32> to vector<2x16x15xf32>
    %94 = tpu.concatenate %93, %90 in 2 : vector<2x16x15xf32>, vector<2x16x1xf32> -> vector<2x16x16xf32>
    %95 = arith.addf %92, %89 : vector<2x16x16xf32>
    %96 = arith.addf %95, %94 : vector<2x16x16xf32>
    %cst_26 = arith.constant 8.100000e+01 : f32
    %97 = vector.broadcast %cst_26 : f32 to vector<2x16x16xf32>
    %98 = arith.divf %44, %97 : vector<2x16x16xf32>
    %cst_27 = arith.constant 8.100000e+01 : f32
    %99 = vector.broadcast %cst_27 : f32 to vector<2x16x16xf32>
    %100 = arith.divf %57, %99 : vector<2x16x16xf32>
    %101 = arith.mulf %100, %44 : vector<2x16x16xf32>
    %102 = arith.subf %96, %101 : vector<2x16x16xf32>
    %103 = arith.mulf %98, %57 : vector<2x16x16xf32>
    %104 = arith.subf %102, %103 : vector<2x16x16xf32>
    %105 = arith.mulf %98, %100 : vector<2x16x16xf32>
    %cst_28 = arith.constant 8.100000e+01 : f32
    %106 = vector.broadcast %cst_28 : f32 to vector<2x16x16xf32>
    %107 = arith.mulf %105, %106 : vector<2x16x16xf32>
    %108 = arith.addf %104, %107 : vector<2x16x16xf32>
    %cst_29 = arith.constant 2.000000e+00 : f32
    %109 = vector.broadcast %cst_29 : f32 to vector<2x16x16xf32>
    %110 = arith.mulf %109, %98 : vector<2x16x16xf32>
    %111 = arith.mulf %110, %44 : vector<2x16x16xf32>
    %112 = arith.subf %70, %111 : vector<2x16x16xf32>
    %113 = arith.mulf %98, %98 : vector<2x16x16xf32>
    %cst_30 = arith.constant 8.100000e+01 : f32
    %114 = vector.broadcast %cst_30 : f32 to vector<2x16x16xf32>
    %115 = arith.mulf %113, %114 : vector<2x16x16xf32>
    %116 = arith.addf %112, %115 : vector<2x16x16xf32>
    %cst_31 = arith.constant 2.000000e+00 : f32
    %117 = vector.broadcast %cst_31 : f32 to vector<2x16x16xf32>
    %118 = arith.mulf %117, %100 : vector<2x16x16xf32>
    %119 = arith.mulf %118, %57 : vector<2x16x16xf32>
    %120 = arith.subf %83, %119 : vector<2x16x16xf32>
    %121 = arith.mulf %100, %100 : vector<2x16x16xf32>
    %cst_32 = arith.constant 8.100000e+01 : f32
    %122 = vector.broadcast %cst_32 : f32 to vector<2x16x16xf32>
    %123 = arith.mulf %121, %122 : vector<2x16x16xf32>
    %124 = arith.addf %120, %123 : vector<2x16x16xf32>
    %125 = arith.mulf %108, %108 : vector<2x16x16xf32>
    %126 = arith.mulf %116, %124 : vector<2x16x16xf32>
    %cst_33 = arith.constant 9.99999974E-6 : f32
    %127 = vector.broadcast %cst_33 : f32 to vector<2x16x16xf32>
    %128 = arith.addf %126, %127 : vector<2x16x16xf32>
    %129 = arith.divf %125, %128 : vector<2x16x16xf32>
    %cst_34 = arith.constant dense<0.000000e+00> : vector<16xf32>
    %130 = vector.multi_reduction <add>, %129, %cst_34 [0, 1] : vector<2x16x16xf32> to vector<16xf32>
    %131 = vector.shape_cast %130 : vector<16xf32> to vector<1x1x16xf32>
    %132 = vector.shape_cast %131 : vector<1x1x16xf32> to vector<1x1x1x16xf32>
    %c0_35 = arith.constant 0 : index
    %c0_36 = arith.constant 0 : index
    %c0_37 = arith.constant 0 : index
    %c0_38 = arith.constant 0 : index
    %133 = vector.load %arg4[%c0_35, %c0_36, %c0_37, %c0_38] : memref<1x1x1x16xf32, #tpu.memory_space<vmem>>, vector<1x1x1x16xf32>
    tpu.vector_store %arg4[%c0_35, %c0_36, %c0_37, %c0_38], %132 {strides = array<i32>} : memref<1x1x1x16xf32, #tpu.memory_space<vmem>>, vector<1x1x1x16xf32>,
    return
  }
  func.func @transform_0(%arg0: i32, %arg1: i32) -> (i32, i32, i32, i32) {
    %c0_i32 = arith.constant 0 : i32
    %c0_i32_0 = arith.constant 0 : i32
    %c0_i32_1 = arith.constant 0 : i32
    return %arg0, %c0_i32, %arg1, %c0_i32_0 : i32, i32, i32, i32
  }
  func.func @transform_1(%arg0: i32, %arg1: i32) -> (i32, i32, i32, i32) {
    %c0_i32 = arith.constant 0 : i32
    %c0_i32_0 = arith.constant 0 : i32
    %c0_i32_1 = arith.constant 0 : i32
    return %arg0, %c0_i32, %arg1, %c0_i32_0 : i32, i32, i32, i32
  }
  func.func @transform_2(%arg0: i32, %arg1: i32) -> (i32, i32, i32, i32) {
    %c0_i32 = arith.constant 0 : i32
    %c0_i32_0 = arith.constant 0 : i32
    %c0_i32_1 = arith.constant 0 : i32
    return %arg0, %arg1, %c0_i32, %c0_i32_0 : i32, i32, i32, i32
  }
}

</mosaic_0001>

<bundles_post_ra>
// kernel: ncc_pallas.1
= control target key start
LH: loop header
LB: loop body
LE: loop exit
PB: predicated region body
PF: predicated region fallthrough
CT: control target
= control target key end

     0   :  { %7 = vsyncpa [#allocation3], 0  ;;  %s1433_s0 = inlined_call_operand.hbm [shape: f32[2,3,16,16], index: 0, kind: input, shape index: {}]   ;;  %s1434_s1 = inlined_call_operand.hbm [shape: f32[2,3,16,16], index: 1, kind: input, shape index: {}]   ;;  %s1435_s2 = inlined_call_operand.vmem [shape: f32[1,1,1,16], index: 2, kind: output, shape index: {}]  }
   0x1   :  { %s13_s11 = sshll.u32 %s1433_s0, 4  ;;  %s14_s11 = int_to_ptr.hbm [resolvable:$true] %s13_s11 }
   0x2   :  { %8 = vsyncpa [#allocation5], 0  ;;  %s805_s12 = smov [#allocation2]   ;;  %s26_s16 = sshll.u32 %s1434_s1, 4  ;;  %s27_s16 = int_to_ptr.hbm [resolvable:$true] %s26_s16 }
   0x3   :  { %s15_s13 = sshll.u32 %s805_s12, 4  ;;  %s806_s17 = smov 128   ;;  %s16_s13 = int_to_ptr.vmem [resolvable:$true] %s15_s13 }
   0x4   :  { %s807_s18 = smov 8   ;;  %s808_s19 = smov [#allocation4]  }
   0x5   :  { %21 = dma.hbm_to_vmem [thread:$0]  %s14_s11, 1536, %s16_s13, [#allocation3], %s806_s17, %s806_s17, %s807_s18  }
   0x6   :  { %s28_s20 = sshll.u32 %s808_s19, 4  ;;  %s29_s20 = int_to_ptr.vmem [resolvable:$true] %s28_s20 }
   0x7   :  { %34 = dma.hbm_to_vmem [thread:$0]  %s27_s16, 1536, %s29_s20, [#allocation5], %s806_s17, %s806_s17, %s807_s18  }
   0x8   :  { %801 = dma.done.wait [#allocation3], 1536  }
   0x9   :  { %802 = vsyncadd [#allocation3], 4294965760 }
   0xa   :  { %803 = dma.done.wait [#allocation5], 1536  }
   0xb   :  { %804 = vsyncadd [#allocation5], 4294965760  ;;  %v833_v0 = vld [vmem:[#allocation2 + $0x30] sm:$0xff]  ;;  %v835_v1 = vld [vmem:[#allocation2 + $0x38] sm:$0xff]  ;;  %vm151_vm0 = vcmask 1040384   ;;  %vm164_vm1 = vcmask 1046528  }
   0xc   :  { %v837_v2 = vld [vmem:[#allocation2 + $0x40] sm:$0xff]  ;;  %v839_v3 = vld [vmem:[#allocation2 + $0x48] sm:$0xff]  ;;  %v843_v5 = vld [vmem:[#allocation2 + $0x50] sm:$0xff]  ;;  %s809_s0 = smov 1   ;;  %s810_s1 = smov 127   ;;  %vm218_vm2 = vcmask 121856  }
   0xd   :  { %v75_v4 = vadd.f32 %v837_v2, %v833_v0  ;;  %v845_v6 = vld [vmem:[#allocation2 + $0x58] sm:$0xff]  ;;  %v76_v7 = vadd.f32 %v839_v3, %v835_v1  ;;  %v849_v8 = vld [vmem:[#allocation2] sm:$0xff]  ;;  %v851_v9 = vld [vmem:[#allocation2 + $0x8] sm:$0xff]  ;;  %vm201_vm3 = vcmask 7168  }
   0xe   :  { %v853_v10 = vld [vmem:[#allocation2 + $0x10] sm:$0xff]  ;;  %v856_v12 = vld [vmem:[#allocation2 + $0x18] sm:$0xff]  ;;  %v860_v14 = vld [vmem:[#allocation2 + $0x20] sm:$0xff] }
   0xf   :  { %v117_v11 = vadd.f32 %v843_v5, %v75_v4  ;;  %v73_v13 = vadd.f32 %v853_v10, %v849_v8  ;;  %v862_v15 = vld [vmem:[#allocation2 + $0x28] sm:$0xff]  ;;  %v118_v16 = vadd.f32 %v845_v6, %v76_v7  ;;  %v74_v17 = vadd.f32 %v856_v12, %v851_v9  ;;  %v867_v18 = vld [vmem:[#allocation4] sm:$0xff]  ;;  %v869_v19 = vld [vmem:[#allocation4 + $0x10] sm:$0xff] }
  0x10   :  { %v77_v29 = vadd.f32 %v869_v19, %v867_v18  ;;  %v877_v33 = vld [vmem:[#allocation4 + $0x8] sm:$0xff]  ;;  %v879_v34 = vld [vmem:[#allocation4 + $0x18] sm:$0xff]  ;;  %v881_v35 = vld [vmem:[#allocation4 + $0x20] sm:$0xff] }
  0x11   :  { %v155_v20 = vrot.slane %v117_v11, 7  ;;  %v168_v21 = vrot.slane %v117_v11, 1  ;;  %v115_v22 = vadd.f32 %v860_v14, %v73_v13  ;;  %v169_v23 = vrot.slane %v118_v16, 1  ;;  %v885_v39 = vld [vmem:[#allocation4 + $0x30] sm:$0xff]  ;;  %v887_v40 = vld [vmem:[#allocation4 + $0x40] sm:$0xff]  ;;  %v900_v49 = vld [vmem:[#allocation4 + $0x28] sm:$0xff] }
  0x12   :  { %v116_v24 = vadd.f32 %v862_v15, %v74_v17  ;;  %v156_v25 = vrot.slane %v118_v16, 7  ;;  %v78_v45 = vadd.f32 %v879_v34, %v877_v33  ;;  %v119_v46 = vadd.f32 %v881_v35, %v77_v29  ;;  %v905_v52 = vld [vmem:[#allocation4 + $0x38] sm:$0xff]  ;;  %v907_v53 = vld [vmem:[#allocation4 + $0x48] sm:$0xff]  ;;  %v909_v54 = vld [vmem:[#allocation4 + $0x50] sm:$0xff] }
  0x13   :  { %v163_v26 = vsel %vm151_vm0, 0.0, %v155_v20  ;;  %v152_v27 = vrot.slane %v115_v22, 7  ;;  %v165_v28 = vrot.slane %v115_v22, 1  ;;  %v170_v30 = vsel %vm164_vm1, %v168_v21, %v169_v23  ;;  %v922_v62 = vld [vmem:[#allocation4 + $0x58] sm:$0xff] }
  0x14   :  { %v179_v31 = vadd.f32 %v163_v26, %v117_v11  ;;  %v166_v32 = vrot.slane %v116_v24, 1  ;;  %v157_v37 = vsel %vm151_vm0, %v155_v20, %v156_v25  ;;  %v153_v38 = vrot.slane %v116_v24, 7 }
  0x15   :  { %v162_v36 = vsel %vm151_vm0, 0.0, %v152_v27  ;;  %v180_v48 = vadd.f32 %v157_v37, %v118_v16  ;;  %v79_v50 = vadd.f32 %v887_v40, %v885_v39  ;;  %v176_v51 = vsel %vm164_vm1, %v169_v23, 0.0 }
  0x16   :  { %v889_v41 = vadd.f32 %v179_v31, %v170_v30  ;;  %v167_v42 = vsel %vm164_vm1, %v165_v28, %v166_v32  ;;  %v177_v43 = vadd.f32 %v162_v36, %v115_v22  ;;  %v154_v44 = vsel %vm151_vm0, %v152_v27, %v153_v38 }
  0x17   :  { %v178_v55 = vadd.f32 %v154_v44, %v116_v24  ;;  %v175_v56 = vsel %vm164_vm1, %v166_v32, 0.0  ;;  %v120_v57 = vadd.f32 %v900_v49, %v78_v45  ;;  %v235_v58 = vrot.slane %v119_v46, 7 }
  0x18   :  { %193 = vrot.lane.b32.xlu1 %v889_v41, %s809_s0  ;;  %v898_v47 = vadd.f32 %v177_v43, %v167_v42  ;;  %v917_v59 = vadd.f32 %v180_v48, %v176_v51  ;;  %v80_v60 = vadd.f32 %v907_v53, %v905_v52  ;;  %v121_v61 = vadd.f32 %v909_v54, %v79_v50 }
  0x19   :  { %v924_v63 = vadd.f32 %v178_v55, %v175_v56  ;;  %v245_v4 = vsel %vm151_vm0, 0.0, %v235_v58  ;;  %v247_v7 = vrot.slane %v119_v46, 1  ;;  %v248_v11 = vrot.slane %v120_v57, 1 }
  0x1a   :  { %206 = vrot.lane.b32.xlu2 %v898_v47, %s810_s1  ;;  %189 = vrot.lane.b32.xlu0 %v898_v47, %s809_s0  ;;  %v122_v13 = vadd.f32 %v922_v62, %v80_v60  ;;  %v238_v16 = vrot.slane %v121_v61, 7  ;;  %v259_v17 = vadd.f32 %v245_v4, %v119_v46  ;;  %v250_v21 = vrot.slane %v121_v61, 1 }
  0x1b   :  { %v249_v20 = vsel %vm164_vm1, %v247_v7, %v248_v11  ;;  %v236_v22 = vrot.slane %v120_v57, 7  ;;  %v51_v25 = vmul.f32 %v849_v8, %v849_v8  ;;  %v81_v26 = vmul.f32 %v853_v10, %v853_v10 }
  0x1c   :  { %v246_v23 = vsel %vm151_vm0, 0.0, %v238_v16  ;;  %v251_v24 = vrot.slane %v122_v13, 1  ;;  %v940_v27 = vadd.f32 %v259_v17, %v249_v20  ;;  %v52_v28 = vmul.f32 %v851_v9, %v851_v9 }
  0x1d   :  { %v82_v29 = vmul.f32 %v856_v12, %v856_v12  ;;  %v261_v30 = vadd.f32 %v246_v23, %v121_v61  ;;  %v237_v31 = vsel %vm151_vm0, %v235_v58, %v236_v22  ;;  %v239_v32 = vrot.slane %v122_v13, 7 }
  0x1e   :  { %v252_v36 = vsel %vm164_vm1, %v250_v21, %v251_v24  ;;  %v85_v37 = vadd.f32 %v81_v26, %v51_v25  ;;  %v123_v38 = vmul.f32 %v860_v14, %v860_v14  ;;  %v260_v42 = vadd.f32 %v237_v31, %v120_v57 }
  0x1f   :  { %v86_v43 = vadd.f32 %v82_v29, %v52_v28  ;;  %v124_v44 = vmul.f32 %v862_v15, %v862_v15  ;;  %v958_v45 = vadd.f32 %v261_v30, %v252_v36  ;;  %v257_v46 = vsel %vm164_vm1, %v248_v11, 0.0 }
  0x20   :  { %195 = vrot.lane.b32.xlu1 %v917_v59, %s809_s0  ;;  %v240_v48 = vsel %vm151_vm0, %v238_v16, %v239_v32  ;;  %v55_v50 = vmul.f32 %v867_v18, %v867_v18  ;;  %v127_v51 = vadd.f32 %v123_v38, %v85_v37  ;;  %v56_v55 = vmul.f32 %v877_v33, %v877_v33 }
  0x21   :  { %v89_v56 = vmul.f32 %v869_v19, %v869_v19  ;;  %v90_v57 = vmul.f32 %v879_v34, %v879_v34  ;;  %v53_v58 = vmul.f32 %v833_v0, %v833_v0  ;;  %v83_v60 = vmul.f32 %v837_v2, %v837_v2 }
  0x22   :  { %208 = vrot.lane.b32.xlu2 %v924_v63, %s810_s1  ;;  %191 = vrot.lane.b32.xlu0 %v924_v63, %s809_s0  ;;  %v974_v61 = vadd.f32 %v260_v42, %v257_v46  ;;  %v128_v4 = vadd.f32 %v124_v44, %v86_v43  ;;  %v258_v7 = vsel %vm164_vm1, %v251_v24, 0.0  ;;  %v262_v11 = vadd.f32 %v240_v48, %v122_v13 }
  0x23   :  { %v131_v16 = vmul.f32 %v881_v35, %v881_v35  ;;  %v315_v17 = vrot.slane %v127_v51, 7  ;;  %v93_v20 = vadd.f32 %v89_v56, %v55_v50  ;;  %v94_v21 = vadd.f32 %v90_v57, %v56_v55 }
  0x24   :  { %v132_v22 = vmul.f32 %v900_v49, %v900_v49  ;;  %v54_v23 = vmul.f32 %v835_v1, %v835_v1  ;;  %v84_v25 = vmul.f32 %v839_v3, %v839_v3  ;;  %v87_v24 = vadd.f32 %v83_v60, %v53_v58 }
  0x25   :  { %v125_v13 = vmul.f32 %v843_v5, %v843_v5  ;;  %v316_v26 = vrot.slane %v128_v4, 7  ;;  %v993_v28 = vadd.f32 %v262_v11, %v258_v7  ;;  %v327_v29 = vrot.slane %v127_v51, 1 }
  0x26   :  { %v325_v30 = vsel %vm151_vm0, 0.0, %v315_v17  ;;  %v328_v31 = vrot.slane %v128_v4, 1  ;;  %v135_v32 = vadd.f32 %v131_v16, %v93_v20  ;;  %v136_v36 = vadd.f32 %v132_v22, %v94_v21 }
  0x27   :  { %v88_v37 = vadd.f32 %v84_v25, %v54_v23  ;;  %v126_v38 = vmul.f32 %v845_v6, %v845_v6  ;;  %v998_v42 = vadd.f32 %v125_v13, %v87_v24  ;;  %v317_v43 = vsel %vm151_vm0, %v315_v17, %v316_v26 }
  0x28   :  { %212 = vrot.lane.b32.xlu1 %v917_v59, %s810_s1  ;;  %v57_v44 = vmul.f32 %v885_v39, %v885_v39  ;;  %v91_v46 = vmul.f32 %v887_v40, %v887_v40  ;;  %v339_v48 = vadd.f32 %v325_v30, %v127_v51  ;;  %v329_v50 = vsel %vm164_vm1, %v327_v29, %v328_v31 }
  0x29   :  { %v395_v55 = vrot.slane %v135_v32, 7  ;;  %v396_v56 = vrot.slane %v136_v36, 7  ;;  %v340_v57 = vadd.f32 %v317_v43, %v128_v4  ;;  %v1008_v58 = vadd.f32 %v126_v38, %v88_v37 }
  0x2a   :  { %271 = vrot.lane.b32.xlu2 %v940_v27, %s809_s0  ;;  %210 = vrot.lane.b32.xlu0 %v889_v41, %s810_s1  ;;  %v318_v60 = vrot.slane %v998_v42, 7  ;;  %v58_v7 = vmul.f32 %v905_v52, %v905_v52  ;;  %v92_v51 = vmul.f32 %v907_v53, %v907_v53  ;;  %v95_v11 = vadd.f32 %v91_v46, %v57_v44 }
  0x2b   :  { %v133_v4 = vmul.f32 %v909_v54, %v909_v54  ;;  %v1021_v16 = vadd.f32 %v339_v48, %v329_v50  ;;  %v337_v17 = vsel %vm164_vm1, %v328_v31, 0.0  ;;  %v407_v20 = vrot.slane %v135_v32, 1 }
  0x2c   :  { %v405_v21 = vsel %vm151_vm0, 0.0, %v395_v55  ;;  %v408_v22 = vrot.slane %v136_v36, 1  ;;  %v397_v23 = vsel %vm151_vm0, %v395_v55, %v396_v56  ;;  %v330_v25 = vrot.slane %v998_v42, 1 }
  0x2d   :  { %v326_v24 = vsel %vm151_vm0, 0.0, %v318_v60  ;;  %v331_v13 = vrot.slane %v1008_v58, 1  ;;  %v59_v26 = vmul.f32 %v867_v18, %v849_v8  ;;  %v97_v29 = vmul.f32 %v869_v19, %v853_v10 }
  0x2e   :  { %v1035_v30 = vadd.f32 %v340_v57, %v337_v17  ;;  %v96_v31 = vadd.f32 %v92_v51, %v58_v7  ;;  %v134_v37 = vmul.f32 %v922_v62, %v922_v62  ;;  %v1039_v38 = vadd.f32 %v133_v4, %v95_v11 }
  0x2f   :  { %v419_v43 = vadd.f32 %v405_v21, %v135_v32  ;;  %v60_v44 = vmul.f32 %v877_v33, %v851_v9  ;;  %v98_v46 = vmul.f32 %v879_v34, %v856_v12  ;;  %v101_v48 = vadd.f32 %v97_v29, %v59_v26 }
  0x30   :  { %275 = vrot.lane.b32.xlu1 %v958_v45, %s809_s0  ;;  %v409_v8 = vsel %vm164_vm1, %v407_v20, %v408_v22  ;;  %v420_v10 = vadd.f32 %v397_v23, %v136_v36  ;;  %v341_v18 = vadd.f32 %v326_v24, %v998_v42  ;;  %v139_v19 = vmul.f32 %v881_v35, %v860_v14 }
  0x31   :  { %v417_v32 = vsel %vm164_vm1, %v408_v22, 0.0  ;;  %v332_v9 = vsel %vm164_vm1, %v330_v25, %v331_v13  ;;  %v102_v33 = vadd.f32 %v98_v46, %v60_v44  ;;  %v140_v12 = vmul.f32 %v900_v49, %v862_v15 }
  0x32   :  { %287 = vrot.lane.b32.xlu2 %v940_v27, %s810_s1  ;;  %273 = vrot.lane.b32.xlu0 %v974_v61, %s809_s0  ;;  %v138_v34 = vadd.f32 %v134_v37, %v96_v31  ;;  %v398_v36 = vrot.slane %v1039_v38, 7  ;;  %v143_v14 = vadd.f32 %v139_v19, %v101_v48  ;;  %v1062_v50 = vadd.f32 %v419_v43, %v409_v8 }
  0x33   :  { %v144_v35 = vadd.f32 %v140_v12, %v102_v33  ;;  %v1064_v55 = vadd.f32 %v420_v10, %v417_v32  ;;  %v1066_v56 = vadd.f32 %v341_v18, %v332_v9  ;;  %v61_v49 = vmul.f32 %v885_v39, %v833_v0 }
  0x34   :  { %v475_v57 = vrot.slane %v143_v14, 7  ;;  %v487_v7 = vrot.slane %v143_v14, 1  ;;  %v99_v51 = vmul.f32 %v887_v40, %v837_v2  ;;  %v406_v11 = vsel %vm151_vm0, 0.0, %v398_v36 }
  0x35   :  { %v488_v15 = vrot.slane %v144_v35, 1  ;;  %v410_v4 = vrot.slane %v1039_v38, 1  ;;  %v411_v17 = vrot.slane %v138_v34, 1  ;;  %v62_v23 = vmul.f32 %v905_v52, %v835_v1 }
  0x36   :  { %v485_v20 = vsel %vm151_vm0, 0.0, %v475_v57  ;;  %v100_v25 = vmul.f32 %v907_v53, %v839_v3  ;;  %v103_v0 = vadd.f32 %v99_v51, %v61_v49  ;;  %v141_v2 = vmul.f32 %v909_v54, %v843_v5 }
  0x37   :  { %v489_v21 = vsel %vm164_vm1, %v487_v7, %v488_v15  ;;  %v499_v22 = vadd.f32 %v485_v20, %v143_v14  ;;  %v142_v24 = vmul.f32 %v922_v62, %v845_v6  ;;  %v421_v1 = vadd.f32 %v406_v11, %v1039_v38 }
  0x38   :  { %277 = vrot.lane.b32.xlu1 %v993_v28, %s809_s0  ;;  %v104_v40 = vadd.f32 %v100_v25, %v62_v23  ;;  %v476_v3 = vrot.slane %v144_v35, 7  ;;  %v145_v52 = vadd.f32 %v141_v2, %v103_v0  ;;  %v412_v53 = vsel %vm164_vm1, %v410_v4, %v411_v17 }
  0x39   :  { %v1084_v39 = vadd.f32 %v499_v22, %v489_v21  ;;  %v319_v5 = vrot.slane %v1008_v58, 7  ;;  %v497_v29 = vsel %vm164_vm1, %v488_v15, 0.0  ;;  %v1097_v43 = vadd.f32 %v421_v1, %v412_v53 }
  0x3a   :  { %291 = vrot.lane.b32.xlu2 %v958_v45, %s810_s1  ;;  %289 = vrot.lane.b32.xlu0 %v974_v61, %s810_s1  ;;  %v146_v54 = vadd.f32 %v142_v24, %v104_v40  ;;  %v477_v26 = vsel %vm151_vm0, %v475_v57, %v476_v3  ;;  %v478_v6 = vrot.slane %v145_v52, 7  ;;  %v490_v31 = vrot.slane %v145_v52, 1 }
  0x3b   :  { %v500_v62 = vadd.f32 %v477_v26, %v144_v35  ;;  %v320_v38 = vsel %vm151_vm0, %v318_v60, %v319_v5  ;;  %v399_v10 = vrot.slane %v138_v34, 7  ;;  %v338_v60 = vsel %vm164_vm1, %v331_v13, 0.0 }
  0x3c   :  { %v491_v37 = vrot.slane %v146_v54, 1  ;;  %v486_v44 = vsel %vm151_vm0, 0.0, %v478_v6  ;;  %v342_v42 = vadd.f32 %v320_v38, %v1008_v58  ;;  %v418_v33 = vsel %vm164_vm1, %v411_v17, 0.0 }
  0x3d   :  { %v1103_v46 = vadd.f32 %v500_v62, %v497_v29  ;;  %v501_v8 = vadd.f32 %v486_v44, %v145_v52  ;;  %v400_v19 = vsel %vm151_vm0, %v398_v36, %v399_v10  ;;  %v479_v12 = vrot.slane %v146_v54, 7 }
  0x3e   :  { %v492_v48 = vsel %vm164_vm1, %v490_v31, %v491_v37  ;;  %v1119_v32 = vadd.f32 %v342_v42, %v338_v60  ;;  %v422_v9 = vadd.f32 %v400_v19, %v138_v34  ;;  %v498_v14 = vsel %vm164_vm1, %v491_v37, 0.0 }
  0x3f   :  { %v1108_v18 = vadd.f32 %v501_v8, %v492_v48  ;;  %v480_v58 = vsel %vm151_vm0, %v478_v6, %v479_v12  ;;  %v811_v24 = vmov 81.0   ;;  %vm714_vm1 = vcmask 130048  }
  0x40   :  { %351 = vrot.lane.b32.xlu1 %v1021_v16, %s809_s0  ;;  %v1129_v13 = vadd.f32 %v422_v9, %v418_v33  ;;  %v502_v36 = vadd.f32 %v480_v58, %v146_v54  ;;  %743 = vrcp.f32 %v811_v24 }
  0x42   :  { %293 = vrot.lane.b32.xlu0 %v993_v28, %s810_s1  ;;  %353 = vrot.lane.b32.xlu2 %v1035_v30, %s809_s0  ;;  %v1132_v35 = vadd.f32 %v502_v36, %v498_v14 }
  0x46   :  { %v744_v52 = vpop.eup %743 }
  0x47   :  { %v552_v5 = vmul.f32 81.0, %v744_v52  ;;  %vm556_vm4 = vweird.f32 %v744_v52 }
  0x48   :  { %433 = vrot.lane.b32.xlu1 %v1064_v55, %s809_s0 }
  0x4a   :  { %431 = vrot.lane.b32.xlu0 %v1062_v50, %s809_s0  ;;  %355 = vrot.lane.b32.xlu2 %v1066_v56, %s809_s0 }
  0x50   :  { %369 = vrot.lane.b32.xlu1 %v1035_v30, %s810_s1 }
  0x52   :  { %367 = vrot.lane.b32.xlu0 %v1021_v16, %s810_s1  ;;  %435 = vrot.lane.b32.xlu2 %v1097_v43, %s809_s0 }
  0x58   :  { %449 = vrot.lane.b32.xlu1 %v1064_v55, %s810_s1 }
  0x5a   :  { %447 = vrot.lane.b32.xlu0 %v1062_v50, %s810_s1  ;;  %357 = vrot.lane.b32.xlu2 %v1119_v32, %s809_s0 }
  0x60   :  { %437 = vrot.lane.b32.xlu1 %v1129_v13, %s809_s0 }
  0x62   :  { %371 = vrot.lane.b32.xlu0 %v1066_v56, %s810_s1  ;;  %451 = vrot.lane.b32.xlu2 %v1097_v43, %s810_s1 }
  0x68   :  { %453 = vrot.lane.b32.xlu1 %v1129_v13, %s810_s1 }
  0x6a   :  { %373 = vrot.lane.b32.xlu0 %v1119_v32, %s810_s1  ;;  %511 = vrot.lane.b32.xlu2 %v1084_v39, %s809_s0 }
  0x70   :  { %515 = vrot.lane.b32.xlu1 %v1108_v18, %s809_s0 }
  0x72   :  { %513 = vrot.lane.b32.xlu0 %v1103_v46, %s809_s0  ;;  %527 = vrot.lane.b32.xlu2 %v1084_v39, %s810_s1 }
  0x74   :  { %v207_v34 = vpop.permute.xlu2 %206 }
  0x75   :  { %v219_v11 = vsel %vm218_vm2, %v207_v34, 0.0 }
  0x78   :  { %517 = vrot.lane.b32.xlu1 %v1132_v35, %s809_s0 }
  0x7a   :  { %529 = vrot.lane.b32.xlu0 %v1103_v46, %s810_s1  ;;  %531 = vrot.lane.b32.xlu2 %v1108_v18, %s810_s1 }
  0x7c   :  { %v209_v57 = vpop.permute.xlu2 %208 }
  0x7d   :  { %v220_v10 = vsel %vm218_vm2, %v209_v57, 0.0 }
  0x82   :  { %533 = vrot.lane.b32.xlu0 %v1132_v35, %s810_s1 }
  0x84   :  { %v272_v7 = vpop.permute.xlu2 %271 }
  0x85   :  { %v283_v6 = vsel %vm201_vm3, 0.0, %v272_v7 }
  0x86   :  { %v303_v44 = vadd.f32 %v283_v6, %v940_v27 }
  0x8a   :  { %v194_v15 = vpop.permute.xlu1 %193 }
  0x8b   :  { %v204_v57 = vsel %vm201_vm3, 0.0, %v194_v15 }
  0x8c   :  { %v190_v49 = vpop.permute.xlu0 %189  ;;  %v288_v51 = vpop.permute.xlu2 %287 }
  0x8d   :  { %v202_v4 = vsel %vm201_vm3, 0.0, %v190_v49  ;;  %v299_v48 = vsel %vm218_vm2, %v288_v51, 0.0 }
  0x8e   :  { %v223_v17 = vadd.f32 %v202_v4, %v898_v47  ;;  %v553_v47 = vsub.f32 1.0, %v552_v5  ;;  %v1182_v9 = vadd.f32 %v303_v44, %v299_v48 }
  0x90   :  { %v1163_v20 = vadd.f32 %v223_v17, %v219_v11  ;;  %v554_v62 = vmul.f32 %v744_v52, %v553_v47 }
  0x92   :  { %v196_v21 = vpop.permute.xlu1 %195  ;;  %v555_v38 = vadd.f32 %v744_v52, %v554_v62 }
  0x93   :  { %v205_v7 = vsel %vm201_vm3, 0.0, %v196_v21  ;;  %v225_v21 = vadd.f32 %v204_v57, %v889_v41 }
  0x94   :  { %v292_v22 = vpop.permute.xlu2 %291  ;;  %v192_v23 = vpop.permute.xlu0 %191  ;;  %v1184_v33 = vsel %vm556_vm4, %v744_v52, %v555_v38  ;;  %v226_v24 = vadd.f32 %v205_v7, %v917_v59 }
  0x95   :  { %v203_v37 = vsel %vm201_vm3, 0.0, %v192_v23  ;;  %v1196_v14 = vmul.f32 %v1184_v33, %v1182_v9 }
  0x96   :  { %v224_v8 = vadd.f32 %v203_v37, %v924_v63  ;;  %v1192_v63 = vmul.f32 %v1184_v33, %v1163_v20 }
  0x97   :  { %v630_v11 = vmul.f32 %v1196_v14, %v1196_v14 }
  0x98   :  { %v1187_v58 = vadd.f32 %v224_v8, %v220_v10  ;;  %v594_v15 = vmul.f32 2.0, %v1192_v63  ;;  %v606_v5 = vmul.f32 %v1192_v63, %v1192_v63 }
  0x9a   :  { %v1165_v25 = vpop.permute.xlu1 %212  ;;  %v1204_v49 = vmul.f32 %v1184_v33, %v1187_v58  ;;  %v598_v44 = vmul.f32 %v594_v15, %v1163_v20 }
  0x9b   :  { %v222_v48 = vsel %vm218_vm2, %v1165_v25, 0.0 }
  0x9c   :  { %v211_v0 = vpop.permute.xlu0 %210  ;;  %v354_v2 = vpop.permute.xlu2 %353  ;;  %v1255_v15 = vadd.f32 %v226_v24, %v222_v48 }
  0x9d   :  { %v364_v4 = vsel %vm201_vm3, 0.0, %v354_v2  ;;  %v221_v62 = vsel %vm218_vm2, %v211_v0, 0.0 }
  0x9e   :  { %v384_v41 = vadd.f32 %v364_v4, %v1035_v30  ;;  %v1236_v30 = vadd.f32 %v225_v21, %v221_v62  ;;  %v610_v21 = vmul.f32 81.0, %v606_v5 }
  0xa0   :  { %v1260_v62 = vmul.f32 %v1184_v33, %v1236_v30 }
  0xa2   :  { %v276_v40 = vpop.permute.xlu1 %275 }
  0xa3   :  { %v285_v17 = vsel %vm201_vm3, 0.0, %v276_v40  ;;  %v595_v40 = vmul.f32 2.0, %v1204_v49 }
  0xa4   :  { %v274_v1 = vpop.permute.xlu0 %273  ;;  %v1167_v3 = vpop.permute.xlu2 %355  ;;  %v305_v59 = vadd.f32 %v285_v17, %v958_v45 }
  0xa5   :  { %v284_v42 = vsel %vm201_vm3, 0.0, %v274_v1  ;;  %v301_v1 = vsel %vm218_vm2, %v292_v22, 0.0  ;;  %v634_v22 = vmul.f32 81.0, %v630_v11 }
  0xa6   :  { %v304_v36 = vadd.f32 %v284_v42, %v974_v61  ;;  %v618_v61 = vmul.f32 2.0, %v1196_v14  ;;  %v599_v42 = vmul.f32 %v595_v40, %v1187_v58 }
  0xa8   :  { %v622_v6 = vmul.f32 %v618_v61, %v1182_v9 }
  0xaa   :  { %v278_v53 = vpop.permute.xlu1 %277 }
  0xab   :  { %v286_v8 = vsel %vm201_vm3, 0.0, %v278_v53 }
  0xac   :  { %v290_v54 = vpop.permute.xlu0 %289  ;;  %v1169_v26 = vpop.permute.xlu2 %435 }
  0xad   :  { %v300_v12 = vsel %vm218_vm2, %v290_v54, 0.0  ;;  %v445_v7 = vsel %vm201_vm3, 0.0, %v1169_v26 }
  0xae   :  { %v1198_v34 = vadd.f32 %v304_v36, %v300_v12  ;;  %v1242_v12 = vadd.f32 %v305_v59, %v301_v1 }
  0xb0   :  { %v1213_v23 = vmul.f32 %v1184_v33, %v1198_v34 }
  0xb2   :  { %v352_v29 = vpop.permute.xlu1 %351  ;;  %v631_v25 = vmul.f32 %v1213_v23, %v1213_v23 }
  0xb3   :  { %v363_v2 = vsel %vm201_vm3, 0.0, %v352_v29  ;;  %v619_v29 = vmul.f32 2.0, %v1213_v23 }
  0xb4   :  { %v1172_v31 = vpop.permute.xlu0 %293  ;;  %v1180_v60 = vpop.permute.xlu2 %357  ;;  %v383_v0 = vadd.f32 %v363_v2, %v1021_v16  ;;  %v306_v16 = vadd.f32 %v286_v8, %v993_v28  ;;  %v635_v40 = vmul.f32 81.0, %v631_v25 }
  0xba   :  { %v434_v19 = vpop.permute.xlu1 %433 }
  0xbb   :  { %v444_v37 = vsel %vm201_vm3, 0.0, %v434_v19  ;;  %v607_v19 = vmul.f32 %v1204_v49, %v1204_v49 }
  0xbc   :  { %v432_v27 = vpop.permute.xlu0 %431  ;;  %v452_v52 = vpop.permute.xlu2 %451  ;;  %v464_v36 = vadd.f32 %v444_v37, %v1064_v55 }
  0xbd   :  { %v443_v45 = vsel %vm201_vm3, 0.0, %v432_v27  ;;  %v623_v27 = vmul.f32 %v619_v29, %v1198_v34  ;;  %v611_v1 = vmul.f32 81.0, %v607_v19  ;;  %v461_v5 = vsel %vm218_vm2, %v452_v52, 0.0 }
  0xbe   :  { %v463_v11 = vadd.f32 %v443_v45, %v1062_v50  ;;  %v1264_v50 = vmul.f32 %v1184_v33, %v1242_v12  ;;  %v596_v45 = vmul.f32 2.0, %v1260_v62 }
  0xc2   :  { %v370_v51 = vpop.permute.xlu1 %369 }
  0xc3   :  { %v380_v47 = vsel %vm218_vm2, %v370_v51, 0.0  ;;  %v302_v51 = vsel %vm218_vm2, %v1172_v31, 0.0  ;;  %v465_v31 = vadd.f32 %v445_v7, %v1097_v43 }
  0xc4   :  { %v368_v54 = vpop.permute.xlu0 %367  ;;  %v388_v10 = vadd.f32 %v384_v41, %v380_v47  ;;  %v512_v26 = vpop.permute.xlu2 %511  ;;  %v1267_v24 = vadd.f32 %v306_v16, %v302_v51 }
  0xc5   :  { %v379_v38 = vsel %vm218_vm2, %v368_v54, 0.0  ;;  %v469_v43 = vadd.f32 %v465_v31, %v461_v5  ;;  %v523_v7 = vsel %vm201_vm3, 0.0, %v512_v26 }
  0xc6   :  { %v387_v57 = vadd.f32 %v383_v0, %v379_v38  ;;  %v603_v55 = vsub.f32 %v388_v10, %v599_v42  ;;  %v620_v38 = vmul.f32 2.0, %v1264_v50  ;;  %v1275_v10 = vmul.f32 %v1184_v33, %v1255_v15 }
  0xc7   :  { %v608_v42 = vmul.f32 %v1260_v62, %v1260_v62 }
  0xc8   :  { %v602_v54 = vsub.f32 %v387_v57, %v598_v44  ;;  %v615_v41 = vadd.f32 %v611_v1, %v603_v55  ;;  %v365_v44 = vsel %vm201_vm3, 0.0, %v1167_v3  ;;  %v624_v19 = vmul.f32 %v620_v38, %v1242_v12 }
  0xc9   :  { %v385_v52 = vadd.f32 %v365_v44, %v1066_v56 }
  0xca   :  { %v450_v53 = vpop.permute.xlu1 %449  ;;  %v614_v29 = vadd.f32 %v610_v21, %v602_v54  ;;  %v628_v16 = vsub.f32 %v469_v43, %v624_v19  ;;  %v612_v21 = vmul.f32 81.0, %v608_v42 }
  0xcb   :  { %v460_v61 = vsel %vm218_vm2, %v450_v53, 0.0 }
  0xcc   :  { %v448_v4 = vpop.permute.xlu0 %447  ;;  %v468_v17 = vadd.f32 %v464_v36, %v460_v61  ;;  %v632_v36 = vmul.f32 %v1264_v50, %v1264_v50  ;;  %v528_v61 = vpop.permute.xlu2 %527 }
  0xcd   :  { %v459_v28 = vsel %vm218_vm2, %v448_v4, 0.0  ;;  %v366_v4 = vsel %vm201_vm3, 0.0, %v1180_v60  ;;  %v609_v60 = vmul.f32 %v1275_v10, %v1275_v10 }
  0xce   :  { %v467_v2 = vadd.f32 %v463_v11, %v459_v28  ;;  %v627_v47 = vsub.f32 %v468_v17, %v623_v27  ;;  %v600_v27 = vmul.f32 %v596_v45, %v1236_v30  ;;  %v597_v11 = vmul.f32 2.0, %v1275_v10 }
  0xcf   :  { %v636_v17 = vmul.f32 81.0, %v632_v36  ;;  %v543_v28 = vadd.f32 %v523_v7, %v1084_v39  ;;  %v386_v31 = vadd.f32 %v366_v4, %v1119_v32  ;;  %v566_v32 = vmul.f32 %v1196_v14, %v1163_v20 }
  0xd0   :  { %v626_v59 = vsub.f32 %v467_v2, %v622_v6  ;;  %v639_v37 = vadd.f32 %v635_v40, %v627_v47  ;;  %v1281_v6 = vmul.f32 %v1184_v33, %v1267_v24  ;;  %v574_v36 = vmul.f32 %v1192_v63, %v1182_v9 }
  0xd1   :  { %v640_v2 = vadd.f32 %v636_v17, %v628_v16  ;;  %v582_v16 = vmul.f32 %v1196_v14, %v1192_v63  ;;  %v584_v9 = vmul.f32 %v1264_v50, %v1260_v62 }
  0xd2   :  { %v638_v48 = vadd.f32 %v634_v22, %v626_v59  ;;  %v647_v8 = vmul.f32 %v639_v37, %v615_v41  ;;  %v438_v0 = vpop.permute.xlu1 %437  ;;  %v621_v55 = vmul.f32 2.0, %v1281_v6  ;;  %v633_v54 = vmul.f32 %v1281_v6, %v1281_v6 }
  0xd3   :  { %v446_v25 = vsel %vm201_vm3, 0.0, %v438_v0  ;;  %v601_v37 = vmul.f32 %v597_v11, %v1255_v15 }
  0xd4   :  { %v646_v3 = vmul.f32 %v638_v48, %v614_v29  ;;  %v372_v22 = vpop.permute.xlu0 %371  ;;  %v1292_v56 = vadd.f32 1e-05, %v647_v8  ;;  %v466_v51 = vadd.f32 %v446_v25, %v1129_v13  ;;  %v539_v13 = vsel %vm218_vm2, %v528_v61, 0.0  ;;  %v532_v19 = vpop.permute.xlu2 %531 }
  0xd5   :  { %v381_v57 = vsel %vm218_vm2, %v372_v22, 0.0  ;;  %v625_v39 = vmul.f32 %v621_v55, %v1267_v24  ;;  %v547_v29 = vadd.f32 %v543_v28, %v539_v13  ;;  %v637_v8 = vmul.f32 81.0, %v633_v54 }
  0xd6   :  { %v1290_v53 = vadd.f32 1e-05, %v646_v3  ;;  %v389_v33 = vadd.f32 %v385_v52, %v381_v57  ;;  %v613_v3 = vmul.f32 81.0, %v609_v60  ;;  %v586_v28 = vmul.f32 81.0, %v582_v16 }
  0xd7   :  { %v570_v57 = vsub.f32 %v547_v29, %v566_v32  ;;  %v568_v54 = vmul.f32 %v1264_v50, %v1236_v30  ;;  %v588_v13 = vmul.f32 81.0, %v584_v9  ;;  %v567_v30 = vmul.f32 %v1213_v23, %v1187_v58 }
  0xd8   :  { %745 = vrcp.f32 %v1290_v53  ;;  %v604_v1 = vsub.f32 %v389_v33, %v600_v27  ;;  %v541_v27 = vsel %vm218_vm2, %v532_v19, 0.0  ;;  %vm659_vm5 = vweird.f32 %v1290_v53 }
  0xd9   :  { %747 = vrcp.f32 %v1292_v56  ;;  %v578_v4 = vsub.f32 %v570_v57, %v574_v36  ;;  %vm674_vm7 = vweird.f32 %v1292_v56 }
  0xda   :  { %v454_v26 = vpop.permute.xlu1 %453  ;;  %v616_v40 = vadd.f32 %v612_v21, %v604_v1  ;;  %v583_v1 = vmul.f32 %v1213_v23, %v1204_v49 }
  0xdb   :  { %v462_v47 = vsel %vm218_vm2, %v454_v26, 0.0  ;;  %v590_v50 = vadd.f32 %v586_v28, %v578_v4 }
  0xdc   :  { %v374_v5 = vpop.permute.xlu0 %373  ;;  %v470_v41 = vadd.f32 %v466_v51, %v462_v47  ;;  %v648_v59 = vmul.f32 %v640_v2, %v616_v40  ;;  %v575_v40 = vmul.f32 %v1204_v49, %v1198_v34 }
  0xdd   :  { %v382_v44 = vsel %vm218_vm2, %v374_v5, 0.0 }
  0xde   :  { %v1314_v38 = vpop.eup %745  ;;  %v390_v48 = vadd.f32 %v386_v31, %v382_v44  ;;  %v629_v0 = vsub.f32 %v470_v41, %v625_v39  ;;  %v1318_v43 = vadd.f32 1e-05, %v648_v59  ;;  %v665_v59 = vand.u32 2147483648, %v1290_v53 }
  0xdf   :  { %v1320_v45 = vpop.eup %747  ;;  %v655_v52 = vmul.f32 %v1314_v38, %v1290_v53  ;;  %vm660_vm6 = vweird.f32 %v1314_v38 }
  0xe0   :  { %v605_v42 = vsub.f32 %v390_v48, %v601_v37  ;;  %v641_v22 = vadd.f32 %v637_v8, %v629_v0  ;;  %749 = vrcp.f32 %v1318_v43  ;;  %v670_v20 = vmul.f32 %v1320_v45, %v1292_v56  ;;  %vm1379_vm11 = vmor %vm659_vm5, %vm660_vm6 }
  0xe1   :  { %v656_v61 = vsub.f32 1.0, %v655_v52  ;;  %vm675_vm8 = vweird.f32 %v1320_v45  ;;  %vm689_vm9 = vweird.f32 %v1318_v43  ;;  %v693_v0 = vand.u32 2147483647, %v1318_v43 }
  0xe2   :  { %v617_v25 = vadd.f32 %v613_v3, %v605_v42  ;;  %v516_v33 = vpop.permute.xlu1 %515  ;;  %v671_v14 = vsub.f32 1.0, %v670_v20  ;;  %v695_v32 = vand.u32 2147483648, %v1318_v43  ;;  %v666_v19 = vor.u32 1.1754944e-38, %v665_v59  ;;  %vm1406_vm15 = vmor %vm674_vm7, %vm675_vm8 }
  0xe3   :  { %v525_v7 = vsel %vm201_vm3, 0.0, %v516_v33  ;;  %v657_v26 = vmul.f32 %v1314_v38, %v656_v61  ;;  %vm694_vm14 = vcmp.eq.f32.partialorder %v693_v0, 8.507059e+37  ;;  %vm728_vm6 = vcmask 122880  }
  0xe4   :  { %v649_v51 = vmul.f32 %v641_v22, %v617_v25  ;;  %v514_v11 = vpop.permute.xlu0 %513  ;;  %v545_v55 = vadd.f32 %v525_v7, %v1108_v18  ;;  %v576_v18 = vmul.f32 %v1260_v62, %v1242_v12  ;;  %v587_v12 = vmul.f32 81.0, %v583_v1 }
  0xe5   :  { %v524_v47 = vsel %vm201_vm3, 0.0, %v514_v11  ;;  %v1357_v62 = vmul.f32 %v1281_v6, %v1255_v15  ;;  %v672_v5 = vmul.f32 %v1320_v45, %v671_v14  ;;  %v658_v34 = vadd.f32 %v1314_v38, %v657_v26 }
  0xe6   :  { %v1336_v17 = vadd.f32 1e-05, %v649_v51  ;;  %v549_v21 = vadd.f32 %v545_v55, %v541_v27  ;;  %v1340_v63 = vpop.eup %749  ;;  %v544_v49 = vadd.f32 %v524_v47, %v1103_v46  ;;  %v663_v15 = vand.u32 2147483647, %v1290_v53 }
  0xe7   :  { %v685_v2 = vmul.f32 %v1340_v63, %v1318_v43  ;;  %vm690_vm10 = vweird.f32 %v1340_v63  ;;  %v662_v3 = vsel %vm1379_vm11, %v1314_v38, %v658_v34  ;;  %v673_v53 = vadd.f32 %v1320_v45, %v672_v5 }
  0xe8   :  { %751 = vrcp.f32 %v1336_v17  ;;  %v572_v31 = vsub.f32 %v549_v21, %v568_v54  ;;  %vm1392_vm12 = vmor %vm689_vm9, %vm690_vm10  ;;  %v678_v25 = vand.u32 2147483647, %v1292_v56  ;;  %v680_v43 = vand.u32 2147483648, %v1292_v56 }
  0xe9   :  { %v686_v60 = vsub.f32 1.0, %v685_v2  ;;  %vm664_vm13 = vcmp.eq.f32.partialorder %v663_v15, 8.507059e+37  ;;  %v642_v7 = vmul.f32 %v590_v50, %v590_v50  ;;  %v696_v27 = vor.u32 1.1754944e-38, %v695_v32 }
  0xea   :  { %v580_v23 = vsub.f32 %v572_v31, %v576_v18  ;;  %v518_v41 = vpop.permute.xlu1 %517  ;;  %v667_v16 = vsel %vm664_vm13, %v666_v19, %v662_v3  ;;  %v677_v55 = vsel %vm1406_vm15, %v1320_v45, %v673_v53  ;;  %v681_v21 = vor.u32 1.1754944e-38, %v680_v43 }
  0xeb   :  { %v687_v58 = vmul.f32 %v1340_v63, %v686_v60  ;;  %v526_v52 = vsel %vm201_vm3, 0.0, %v518_v41  ;;  %v585_v1 = vmul.f32 %v1281_v6, %v1275_v10  ;;  %vm679_vm0 = vcmp.eq.f32.partialorder %v678_v25, 8.507059e+37 }
  0xec   :  { %v530_v39 = vpop.permute.xlu0 %529  ;;  %v592_v42 = vadd.f32 %v588_v13, %v580_v23  ;;  %v546_v20 = vadd.f32 %v526_v52, %v1132_v35  ;;  %v577_v54 = vmul.f32 %v1275_v10, %v1267_v24  ;;  %v682_v18 = vsel %vm679_vm0, %v681_v21, %v677_v55 }
  0xed   :  { %v540_v37 = vsel %vm218_vm2, %v530_v39, 0.0  ;;  %v688_v29 = vadd.f32 %v1340_v63, %v687_v58  ;;  %v589_v6 = vmul.f32 81.0, %v585_v1  ;;  %v708_v10 = vand.u32 2147483647, %v1336_v17 }
  0xee   :  { %v1370_v44 = vpop.eup %751  ;;  %v548_v46 = vadd.f32 %v544_v49, %v540_v37  ;;  %v644_v51 = vmul.f32 %v592_v42, %v592_v42 }
  0xef   :  { %v700_v8 = vmul.f32 %v1370_v44, %v1336_v17  ;;  %v692_v33 = vsel %vm1392_vm12, %v1340_v63, %v688_v29  ;;  %v668_v63 = vmul.f32 %v667_v16, %v642_v7  ;;  %vm705_vm3 = vweird.f32 %v1370_v44 }
  0xf0   :  { %v571_v22 = vsub.f32 %v548_v46, %v567_v30  ;;  %v697_v4 = vsel %vm694_vm14, %v696_v27, %v692_v33  ;;  %vm709_vm5 = vcmp.eq.f32.partialorder %v708_v10, 8.507059e+37 }
  0xf1   :  { %v701_v36 = vsub.f32 1.0, %v700_v8  ;;  %v698_v45 = vmul.f32 %v697_v4, %v644_v51  ;;  %v715_v47 = vsel %vm714_vm1, %v668_v63, 0.0 }
  0xf2   :  { %v579_v38 = vsub.f32 %v571_v22, %v575_v40  ;;  %v710_v40 = vand.u32 2147483648, %v1336_v17 }
  0xf3   :  { %v702_v35 = vmul.f32 %v1370_v44, %v701_v36  ;;  %v718_v50 = vsel %vm714_vm1, %v698_v45, 0.0 }
  0xf4   :  { %v591_v11 = vadd.f32 %v587_v12, %v579_v38  ;;  %v534_v9 = vpop.permute.xlu0 %533 }
  0xf5   :  { %v542_v56 = vsel %vm218_vm2, %v534_v9, 0.0  ;;  %v703_v13 = vadd.f32 %v1370_v44, %v702_v35  ;;  %vm704_vm2 = vweird.f32 %v1336_v17 }
  0xf6   :  { %v643_v14 = vmul.f32 %v591_v11, %v591_v11  ;;  %v550_v28 = vadd.f32 %v546_v20, %v542_v56  ;;  %vm706_vm4 = vmor %vm704_vm2, %vm705_vm3 }
  0xf7   :  { %v707_v12 = vsel %vm706_vm4, %v1370_v44, %v703_v13 }
  0xf8   :  { %v683_v26 = vmul.f32 %v682_v18, %v643_v14  ;;  %v573_v2 = vsub.f32 %v550_v28, %v1357_v62  ;;  %v711_v62 = vor.u32 1.1754944e-38, %v710_v40 }
  0xfa   :  { %v716_v31 = vsel %vm714_vm1, %v683_v26, 0.0  ;;  %v581_v24 = vsub.f32 %v573_v2, %v577_v54  ;;  %v712_v49 = vsel %vm709_vm5, %v711_v62, %v707_v12 }
  0xfb   :  { %v717_v30 = vadd.f32 %v716_v31, %v715_v47 }
  0xfc   :  { %v593_v60 = vadd.f32 %v589_v6, %v581_v24 }
  0xfd   :  { %v719_v5 = vadd.f32 %v718_v50, %v717_v30 }
  0xfe   :  { %v645_v34 = vmul.f32 %v593_v60, %v593_v60 }
 0x100   :  { %v713_v58 = vmul.f32 %v712_v49, %v645_v34 }
 0x102   :  { %v720_v23 = vsel %vm714_vm1, %v713_v58, 0.0 }
 0x103   :  { %v721_v39 = vadd.f32 %v720_v23, %v719_v5 }
 0x105   :  { %v722_v41 = vrot.slane %v721_v39, 4 }
 0x107   :  { %v723_v15 = vadd.f32 %v722_v41, %v721_v39 }
 0x109   :  { %v724_v59 = vrot.slane %v723_v15, 2 }
 0x10b   :  { %v725_v17 = vadd.f32 %v724_v59, %v723_v15 }
 0x10d   :  { %v726_v37 = vrot.slane %v725_v17, 1 }
 0x10f   :  { %v727_v29 = vadd.f32 %v726_v37, %v725_v17 }
 0x111   :  { %729 = vst.msk [vmem:[%s1435_s2] sm:$0x1] %vm728_vm6, %v727_v29 }
 0x112   :  { %734 = vsyncpa [#allocation3], 1 }
 0x113   :  { %735 = vsyncpa [#allocation5], 1 }

</bundles_post_ra>
